<compile_context>
chip_gen: v7x
topology: tpu7x:2x2x1
jax: 0.10.0
libtpu: 0.0.40
codegen_flags: <defaults>
</compile_context>

<pallas_src>
import functools

import jax
import jax.numpy as jnp
from jax import lax
from jax.experimental import pallas as pl
from jax.experimental.pallas import tpu as pltpu


def _round_up(x, m):
    return (x + m - 1) // m * m


def _tcn_block_kernel(x_hbm_ref, w1_ref, b1_ref, w2_ref, b2_ref, wd_ref, bd_ref,
                      *rest, TL, K, dilation, pad, pad_al, with_res):
    """One (batch element, L-tile) step of the fused TCN residual block.

    x_hbm_ref : (N, 2*pad_al + L_pad, Cip) full input, left in HBM (pl.ANY).
    w1_ref    : (K*Cip, Cop)  conv1 weight, tap-major "im2col" layout.
    w2_ref    : (K*Cop, Cop)  conv2 weight, tap-major "im2col" layout.
    wd_ref    : (Cip, Cop)    1x1 downsample weight.
    b*_ref    : (1, Cop)      float32 biases.
    outputs   : (1, TL, Cop) tiles of `out` (and `res` when with_res).
    scratch   : VMEM (TL + 2*pad_al, Cip) input window + one DMA semaphore.
    """
    if with_res:
        out_ref, res_ref, xwin_ref, dma_sem = rest
    else:
        out_ref, xwin_ref, dma_sem = rest
        res_ref = None

    n = pl.program_id(0)
    l = pl.program_id(1)
    P = 2 * pad_al               # rows of left zero-pad carried in the window
    TLP = TL + P                 # fetched window rows
    TLH = TL + pad_al            # conv1 rows needed to feed conv2's halo
    base = pad_al - pad          # first tap offset inside the window / h1

    # ---- fetch this tile's input window (tile rows + causal halo) ----------
    start = pl.multiple_of(l * TL, 8)
    cp = pltpu.make_async_copy(x_hbm_ref.at[n, pl.ds(start, TLP), :],
                               xwin_ref, dma_sem)
    cp.start()
    cp.wait()
    # TODO(synk): double-buffer this halo DMA across grid steps (pattern P4) to
    # hide the fetch; kept synchronous so it stays safe under megacore splits.

    xw = xwin_ref[...]                       # (TLP, Cip), compute dtype
    cdtype = xw.dtype

    # ---- conv1: channel-im2col -> one wide-contraction MXU matmul ----------
    slab1 = jnp.concatenate(
        [xw[base + k * dilation: base + k * dilation + TLH, :] for k in range(K)],
        axis=-1)                             # (TLH, K*Cip)
    h1 = jnp.dot(slab1, w1_ref[...], preferred_element_type=jnp.float32)
    h1 = jnp.maximum(h1 + b1_ref[...], 0.0)
    # Zero rows whose sequence position is < 0 so conv2 sees true zero padding
    # (not relu(b1)); only bites inside the first L-tile.
    row = lax.broadcasted_iota(jnp.int32, (TLH, 1), 0)
    h1 = jnp.where(row + l * TL >= pad_al, h1, 0.0).astype(cdtype)
    # TODO(synk): dropout1 / dropout2 are identity (inference-mode semantics).

    # ---- conv2: same trick on the conv1 output kept on-chip -----------------
    slab2 = jnp.concatenate(
        [h1[base + k * dilation: base + k * dilation + TL, :] for k in range(K)],
        axis=-1)                             # (TL, K*Cop)
    h2 = jnp.dot(slab2, w2_ref[...], preferred_element_type=jnp.float32)
    h2 = jnp.maximum(h2 + b2_ref[...], 0.0)

    # ---- downsample (1x1 conv) on the raw rows of this tile -----------------
    res = jnp.dot(xw[P:P + TL, :], wd_ref[...],
                  preferred_element_type=jnp.float32) + bd_ref[...]

    out_ref[0] = jnp.maximum(h2 + res, 0.0).astype(out_ref.dtype)
    if with_res:
        res_ref[0] = res.astype(res_ref.dtype)


def temporal_skip_block(x, params, *, kernel_size, dilation, use_skips=False,
                        tile_l=None, compute_dtype=jnp.bfloat16):
    """Forward pass. `x` is (N, C_in, L) like PyTorch, or an (x, skip) tuple."""
    skip = None
    if isinstance(x, tuple):
        x, skip = x

    N, C_in, L = x.shape
    K = kernel_size
    pad = (K - 1) * dilation               # TCN padding; chomp == causal conv
    C_out = params["b1"].shape[-1]

    # lane-dense channel padding + sublane-aligned causal padding
    Cip = _round_up(C_in, 128)
    Cop = _round_up(C_out, 128)
    pad_al = _round_up(pad, 8)
    P = 2 * pad_al

    # L tiling (multiple of 8; default sized well under the 32 MiB VMEM budget)
    if tile_l is None:
        tile_l = 256
    TL = max(8, _round_up(min(tile_l, _round_up(L, 8)), 8))
    L_pad = _round_up(L, TL)
    n_tiles = L_pad // TL

    cdtype = compute_dtype
    out_dtype = x.dtype

    # NOTE: accepting/returning NLC at the API would remove these wrapper
    # transpose/pad passes; kept NCW here to match the PyTorch module.
    x_nlc = jnp.transpose(x, (0, 2, 1)).astype(cdtype)              # (N, L, C_in)
    xp = jnp.pad(x_nlc, ((0, 0), (P, L_pad - L), (0, Cip - C_in)))  # (N, P+L_pad, Cip)

    w1 = jnp.pad(params["w1"].astype(cdtype),
                 ((0, 0), (0, Cip - C_in), (0, Cop - C_out))).reshape(K * Cip, Cop)
    w2 = jnp.pad(params["w2"].astype(cdtype),
                 ((0, 0), (0, Cop - C_out), (0, Cop - C_out))).reshape(K * Cop, Cop)
    wd = jnp.pad(params["wd"].astype(cdtype), ((0, Cip - C_in), (0, Cop - C_out)))
    b1 = jnp.pad(params["b1"].astype(jnp.float32), ((0, 0), (0, Cop - C_out)))
    b2 = jnp.pad(params["b2"].astype(jnp.float32), ((0, 0), (0, Cop - C_out)))
    bd = jnp.pad(params["bd"].astype(jnp.float32), ((0, 0), (0, Cop - C_out)))

    with_res = bool(use_skips)
    kernel = functools.partial(_tcn_block_kernel, TL=TL, K=K, dilation=dilation,
                               pad=pad, pad_al=pad_al, with_res=with_res)

    out_block = pl.BlockSpec((1, TL, Cop), lambda n, l: (n, l, 0))
    if with_res:
        out_shape = (jax.ShapeDtypeStruct((N, L_pad, Cop), out_dtype),
                     jax.ShapeDtypeStruct((N, L_pad, Cop), out_dtype))
        out_specs = (out_block, pl.BlockSpec((1, TL, Cop), lambda n, l: (n, l, 0)))
    else:
        out_shape = jax.ShapeDtypeStruct((N, L_pad, Cop), out_dtype)
        out_specs = out_block

    result = pl.pallas_call(
        kernel,
        out_shape=out_shape,
        grid_spec=pltpu.PrefetchScalarGridSpec(
            num_scalar_prefetch=0,
            grid=(N, n_tiles),
            in_specs=[
                pl.BlockSpec(memory_space=pl.ANY),                   # x (manual halo DMA)
                pl.BlockSpec((K * Cip, Cop), lambda n, l: (0, 0)),   # w1 (im2col layout)
                pl.BlockSpec((1, Cop), lambda n, l: (0, 0)),         # b1
                pl.BlockSpec((K * Cop, Cop), lambda n, l: (0, 0)),   # w2 (im2col layout)
                pl.BlockSpec((1, Cop), lambda n, l: (0, 0)),         # b2
                pl.BlockSpec((Cip, Cop), lambda n, l: (0, 0)),       # wd
                pl.BlockSpec((1, Cop), lambda n, l: (0, 0)),         # bd
            ],
            out_specs=out_specs,
            scratch_shapes=[
                pltpu.VMEM((TL + P, Cip), cdtype),    # input window (tile + halo)
                pltpu.SemaphoreType.DMA,              # halo DMA completion
            ]),
        compiler_params=pltpu.CompilerParams(
            dimension_semantics=("parallel", "parallel"),
            vmem_limit_bytes=32 * 1024 * 1024),
    )(xp, w1, b1, w2, b2, wd, bd)

    if with_res:
        out_nlc, res_nlc = result
    else:
        out_nlc = result

    out = jnp.transpose(out_nlc[:, :L, :C_out], (0, 2, 1))           # (N, C_out, L)
    if not use_skips:
        return out
    res = jnp.transpose(res_nlc[:, :L, :C_out], (0, 2, 1))
    if skip is not None:
        return out, skip + res
    return out, res


# ----------------------------- reference & params -----------------------------

def tcn_block_reference(x, params, *, kernel_size, dilation):
    """Pure-JAX reference of TemporalSkipBlock forward (inference mode)."""
    N, C_in, L = x.shape
    K = kernel_size
    pad = (K - 1) * dilation

    def causal_conv(h_nlc, w, b):            # w: (K, Cin, Cout), b: (1, Cout)
        hp = jnp.pad(h_nlc, ((0, 0), (pad, 0), (0, 0)))
        acc = jnp.zeros((N, L, w.shape[2]), jnp.float32) + b
        for k in range(K):
            acc = acc + jnp.einsum("nlc,cd->nld",
                                   hp[:, k * dilation:k * dilation + L, :], w[k],
                                   preferred_element_type=jnp.float32)
        return acc

    x_nlc = jnp.transpose(x, (0, 2, 1)).astype(jnp.float32)
    h1 = jax.nn.relu(causal_conv(x_nlc, params["w1"], params["b1"]))
    h2 = jax.nn.relu(causal_conv(h1, params["w2"], params["b2"]))
    res = jnp.einsum("nlc,cd->nld", x_nlc, params["wd"],
                     preferred_element_type=jnp.float32) + params["bd"]
    out = jax.nn.relu(h2 + res)
    return jnp.transpose(out, (0, 2, 1)), jnp.transpose(res, (0, 2, 1))


def _weight_norm(v):
    """Effective weight of torch weight_norm (dim=0): g * v / ||v|| with g=||v|| at init."""
    norm = jnp.sqrt(jnp.sum(v * v, axis=(1, 2), keepdims=True))
    g = norm                                 # init: g = ||v|| (identity at init)
    return g * v / norm


def init_params(key, c_in, c_out, K):
    """Deterministic synthetic params matching nn.Conv1d shapes (normal(0, 0.01) weights)."""
    k1, k2, k3, k4, k5, k6 = jax.random.split(key, 6)
    v1 = 0.01 * jax.random.normal(k1, (c_out, c_in, K), jnp.float32)
    v2 = 0.01 * jax.random.normal(k2, (c_out, c_out, K), jnp.float32)
    vd = 0.01 * jax.random.normal(k3, (c_out, c_in, 1), jnp.float32)
    w1_t = _weight_norm(v1)                  # (C_out, C_in, K)
    w2_t = _weight_norm(v2)
    b1 = 0.1 * jax.random.uniform(k4, (1, c_out), jnp.float32, -1.0, 1.0)
    b2 = 0.1 * jax.random.uniform(k5, (1, c_out), jnp.float32, -1.0, 1.0)
    bd = 0.1 * jax.random.uniform(k6, (1, c_out), jnp.float32, -1.0, 1.0)
    return {
        "w1": jnp.transpose(w1_t, (2, 1, 0)),            # (K, C_in, C_out)
        "b1": b1,
        "w2": jnp.transpose(w2_t, (2, 1, 0)),            # (K, C_out, C_out)
        "b2": b2,
        "wd": jnp.transpose(vd[:, :, 0], (1, 0)),        # (C_in, C_out)
        "bd": bd,
    }


if __name__ == "__main__":
    key = jax.random.PRNGKey(0)
    k1, k2, k3, k4 = jax.random.split(key, 4)

    # --- config 1: tiny shapes, single L tile -------------------------------
    N, C_in, C_out, L, K, d = 2, 4, 8, 16, 3, 2
    x = jax.random.normal(k1, (N, C_in, L), jnp.float32)
    params = init_params(k2, C_in, C_out, K)
    ref_out, ref_res = tcn_block_reference(x, params, kernel_size=K, dilation=d)

    # float32 compute path, no skips (res never written to HBM)
    out_f32 = temporal_skip_block(x, params, kernel_size=K, dilation=d,
                                  use_skips=False, compute_dtype=jnp.float32)
    out_f32 = jax.block_until_ready(out_f32)
    assert out_f32.shape == (N, C_out, L)
    assert jnp.allclose(out_f32, ref_out, atol=2e-3, rtol=2e-2)

    # bfloat16 compute path with skip outputs
    out_bf, res_bf = temporal_skip_block(x, params, kernel_size=K, dilation=d,
                                         use_skips=True)
    jax.block_until_ready((out_bf, res_bf))
    assert jnp.allclose(out_bf, ref_out, atol=5e-3, rtol=5e-2)
    assert jnp.allclose(res_bf, ref_res, atol=5e-3, rtol=5e-2)

    # tuple-input skip path: skip accumulates res
    skip0 = jax.random.normal(k3, (N, C_out, L), jnp.float32)
    out_t, skip_t = temporal_skip_block((x, skip0), params, kernel_size=K,
                                        dilation=d, use_skips=True)
    jax.block_until_ready((out_t, skip_t))
    assert jnp.allclose(skip_t, skip0 + res_bf, atol=1e-5, rtol=1e-5)

    # --- config 2: multi-L-tile path (halo DMA + boundary masking) ----------
    N2, C_in2, C_out2, L2, K2, d2 = 2, 3, 5, 40, 3, 3
    x2 = jax.random.normal(k4, (N2, C_in2, L2), jnp.float32)
    params2 = init_params(jax.random.PRNGKey(7), C_in2, C_out2, K2)
    ref2_out, _ = tcn_block_reference(x2, params2, kernel_size=K2, dilation=d2)
    out2 = temporal_skip_block(x2, params2, kernel_size=K2, dilation=d2,
                               use_skips=False, tile_l=16,
                               compute_dtype=jnp.float32)
    out2 = jax.block_until_ready(out2)
    assert out2.shape == (N2, C_out2, L2)
    assert jnp.allclose(out2, ref2_out, atol=2e-3, rtol=2e-2)

    print("KERNEL_OK")
</pallas_src>

<mosaic_0001>
module attributes {stable_mosaic.version = 11 : i64} {
  func.func @_tcn_block_kernel(%arg0: i32, %arg1: i32, %arg2: memref<2x32x128xf32, #tpu.memory_space<any>>, %arg3: memref<384x128xf32, #tpu.memory_space<vmem>>, %arg4: memref<1x128xf32, #tpu.memory_space<vmem>>, %arg5: memref<384x128xf32, #tpu.memory_space<vmem>>, %arg6: memref<1x128xf32, #tpu.memory_space<vmem>>, %arg7: memref<128x128xf32, #tpu.memory_space<vmem>>, %arg8: memref<1x128xf32, #tpu.memory_space<vmem>>, %arg9: memref<1x16x128xf32, #tpu.memory_space<vmem>>, %arg10: memref<32x128xf32, #tpu.memory_space<vmem>>, %arg11: memref<!tpu.dma_semaphore, #tpu.memory_space<semaphore_mem>>) attributes {dimension_semantics = [#tpu.dimension_semantics<parallel>, #tpu.dimension_semantics<parallel>], iteration_bounds = array<i64: 2, 1>, scalar_prefetch = 0 : i64, scratch_operands = 2 : i64, tpu.core_type = #tpu.core_type<tc>, window_params = [{}, {pipeline_mode = #tpu.pipeline_mode<synchronous>, transform_indices = @transform_1, window_bounds = array<i64: 384, 128>}, {pipeline_mode = #tpu.pipeline_mode<synchronous>, transform_indices = @transform_2, window_bounds = array<i64: 1, 128>}, {pipeline_mode = #tpu.pipeline_mode<synchronous>, transform_indices = @transform_3, window_bounds = array<i64: 384, 128>}, {pipeline_mode = #tpu.pipeline_mode<synchronous>, transform_indices = @transform_4, window_bounds = array<i64: 1, 128>}, {pipeline_mode = #tpu.pipeline_mode<synchronous>, transform_indices = @transform_5, window_bounds = array<i64: 128, 128>}, {pipeline_mode = #tpu.pipeline_mode<synchronous>, transform_indices = @transform_6, window_bounds = array<i64: 1, 128>}, {transform_indices = @transform_7, window_bounds = array<i64: 1, 16, 128>}]} {
    %c16_i32 = arith.constant 16 : i32
    %0 = arith.muli %arg1, %c16_i32 : i32
    %1 = tpu.assume_multiple %0, 8 : i32
    %c0_i32 = arith.constant 0 : i32
    %2 = tpu.memref_slice %arg2[%arg0, %1, %c0_i32] : memref<2x32x128xf32, #tpu.memory_space<any>> -> memref<1x32x128xf32, #tpu.memory_space<any>>
    %3 = tpu.memref_squeeze %2 : memref<1x32x128xf32, #tpu.memory_space<any>> -> memref<32x128xf32, #tpu.memory_space<any>>
    tpu.enqueue_dma source(%3 : memref<32x128xf32, #tpu.memory_space<any>>) target(%arg10 : memref<32x128xf32, #tpu.memory_space<vmem>>) target_semaphore(%arg11 : memref<!tpu.dma_semaphore, #tpu.memory_space<semaphore_mem>>)
    %c0_i32_0 = arith.constant 0 : i32
    %4 = tpu.memref_slice %arg2[%arg0, %1, %c0_i32_0] : memref<2x32x128xf32, #tpu.memory_space<any>> -> memref<1x32x128xf32, #tpu.memory_space<any>>
    %5 = tpu.memref_squeeze %4 : memref<1x32x128xf32, #tpu.memory_space<any>> -> memref<32x128xf32, #tpu.memory_space<any>>
    tpu.wait_dma2 semaphore(%arg11 : memref<!tpu.dma_semaphore, #tpu.memory_space<semaphore_mem>>) src(%5 : memref<32x128xf32, #tpu.memory_space<any>>) dst(%arg10 : memref<32x128xf32, #tpu.memory_space<vmem>>)
    %c0 = arith.constant 0 : index
    %c0_1 = arith.constant 0 : index
    %6 = vector.load %arg10[%c0, %c0_1] : memref<32x128xf32, #tpu.memory_space<vmem>>, vector<32x128xf32>
    %7 = vector.extract_strided_slice %6 {offsets = [4, 0], sizes = [24, 128], strides = [1, 1]} : vector<32x128xf32> to vector<24x128xf32>
    %8 = vector.extract_strided_slice %6 {offsets = [6, 0], sizes = [24, 128], strides = [1, 1]} : vector<32x128xf32> to vector<24x128xf32>
    %9 = vector.extract_strided_slice %6 {offsets = [8, 0], sizes = [24, 128], strides = [1, 1]} : vector<32x128xf32> to vector<24x128xf32>
    %10 = tpu.concatenate %7, %8, %9 in 1 : vector<24x128xf32>, vector<24x128xf32>, vector<24x128xf32> -> vector<24x384xf32>
    %c0_2 = arith.constant 0 : index
    %c0_3 = arith.constant 0 : index
    %11 = vector.load %arg3[%c0_2, %c0_3] : memref<384x128xf32, #tpu.memory_space<vmem>>, vector<384x128xf32>
    %cst = arith.constant dense<0.000000e+00> : vector<24x128xf32>
    %12 = tpu.matmul %10, %11, %cst {dimension_numbers = #tpu.dot_dimension_numbers<[1], [0], [0], [1], [0, 0, 1, 1], [], []>} : vector<24x384xf32>, vector<384x128xf32>, vector<24x128xf32> -> vector<24x128xf32>
    %c0_4 = arith.constant 0 : index
    %c0_5 = arith.constant 0 : index
    %13 = vector.load %arg4[%c0_4, %c0_5] : memref<1x128xf32, #tpu.memory_space<vmem>>, vector<1x128xf32>
    %14 = vector.broadcast %13 : vector<1x128xf32> to vector<24x128xf32>
    %15 = arith.addf %12, %14 : vector<24x128xf32>
    %cst_6 = arith.constant 0.000000e+00 : f32
    %16 = vector.broadcast %cst_6 : f32 to vector<24x128xf32>
    %17 = arith.maximumf %15, %16 : vector<24x128xf32>
    %18 = tpu.iota {dimensions = array<i32: 0>} : vector<24x1xi32>
    %c16_i32_7 = arith.constant 16 : i32
    %19 = arith.muli %arg1, %c16_i32_7 : i32
    %20 = vector.broadcast %19 : i32 to vector<24x1xi32>
    %21 = arith.addi %18, %20 : vector<24x1xi32>
    %c8_i32 = arith.constant 8 : i32
    %22 = vector.broadcast %c8_i32 : i32 to vector<24x1xi32>
    %23 = arith.cmpi sge, %21, %22 : vector<24x1xi32>
    %cst_8 = arith.constant 0.000000e+00 : f32
    %24 = vector.shape_cast %23 : vector<24x1xi1> to vector<24x1xi1>
    %25 = vector.broadcast %24 : vector<24x1xi1> to vector<24x128xi1>
    %26 = vector.broadcast %cst_8 : f32 to vector<24x128xf32>
    %27 = arith.select %25, %17, %26 : vector<24x128xi1>, vector<24x128xf32>
    %28 = vector.extract_strided_slice %27 {offsets = [4, 0], sizes = [16, 128], strides = [1, 1]} : vector<24x128xf32> to vector<16x128xf32>
    %29 = vector.extract_strided_slice %27 {offsets = [6, 0], sizes = [16, 128], strides = [1, 1]} : vector<24x128xf32> to vector<16x128xf32>
    %30 = vector.extract_strided_slice %27 {offsets = [8, 0], sizes = [16, 128], strides = [1, 1]} : vector<24x128xf32> to vector<16x128xf32>
    %31 = tpu.concatenate %28, %29, %30 in 1 : vector<16x128xf32>, vector<16x128xf32>, vector<16x128xf32> -> vector<16x384xf32>
    %c0_9 = arith.constant 0 : index
    %c0_10 = arith.constant 0 : index
    %32 = vector.load %arg5[%c0_9, %c0_10] : memref<384x128xf32, #tpu.memory_space<vmem>>, vector<384x128xf32>
    %cst_11 = arith.constant dense<0.000000e+00> : vector<16x128xf32>
    %33 = tpu.matmul %31, %32, %cst_11 {dimension_numbers = #tpu.dot_dimension_numbers<[1], [0], [0], [1], [0, 0, 1, 1], [], []>} : vector<16x384xf32>, vector<384x128xf32>, vector<16x128xf32> -> vector<16x128xf32>
    %c0_12 = arith.constant 0 : index
    %c0_13 = arith.constant 0 : index
    %34 = vector.load %arg6[%c0_12, %c0_13] : memref<1x128xf32, #tpu.memory_space<vmem>>, vector<1x128xf32>
    %35 = vector.broadcast %34 : vector<1x128xf32> to vector<16x128xf32>
    %36 = arith.addf %33, %35 : vector<16x128xf32>
    %cst_14 = arith.constant 0.000000e+00 : f32
    %37 = vector.broadcast %cst_14 : f32 to vector<16x128xf32>
    %38 = arith.maximumf %36, %37 : vector<16x128xf32>
    %39 = vector.extract_strided_slice %6 {offsets = [16, 0], sizes = [16, 128], strides = [1, 1]} : vector<32x128xf32> to vector<16x128xf32>
    %c0_15 = arith.constant 0 : index
    %c0_16 = arith.constant 0 : index
    %40 = vector.load %arg7[%c0_15, %c0_16] : memref<128x128xf32, #tpu.memory_space<vmem>>, vector<128x128xf32>
    %cst_17 = arith.constant dense<0.000000e+00> : vector<16x128xf32>
    %41 = tpu.matmul %39, %40, %cst_17 {dimension_numbers = #tpu.dot_dimension_numbers<[1], [0], [0], [1], [0, 0, 1, 1], [], []>} : vector<16x128xf32>, vector<128x128xf32>, vector<16x128xf32> -> vector<16x128xf32>
    %c0_18 = arith.constant 0 : index
    %c0_19 = arith.constant 0 : index
    %42 = vector.load %arg8[%c0_18, %c0_19] : memref<1x128xf32, #tpu.memory_space<vmem>>, vector<1x128xf32>
    %43 = vector.broadcast %42 : vector<1x128xf32> to vector<16x128xf32>
    %44 = arith.addf %41, %43 : vector<16x128xf32>
    %45 = arith.addf %38, %44 : vector<16x128xf32>
    %cst_20 = arith.constant 0.000000e+00 : f32
    %46 = vector.broadcast %cst_20 : f32 to vector<16x128xf32>
    %47 = arith.maximumf %45, %46 : vector<16x128xf32>
    %c0_21 = arith.constant 0 : index
    %c0_22 = arith.constant 0 : index
    %c0_23 = arith.constant 0 : index
    %48 = vector.load %arg9[%c0_21, %c0_22, %c0_23] : memref<1x16x128xf32, #tpu.memory_space<vmem>>, vector<1x16x128xf32>
    %49 = vector.shape_cast %48 : vector<1x16x128xf32> to vector<16x128xf32>
    %50 = vector.shape_cast %47 : vector<16x128xf32> to vector<1x16x128xf32>
    tpu.vector_store %arg9[%c0_21, %c0_22, %c0_23], %50 {strides = array<i32>} : memref<1x16x128xf32, #tpu.memory_space<vmem>>, vector<1x16x128xf32>,
    return
  }
  func.func @transform_1(%arg0: i32, %arg1: i32) -> (i32, i32) {
    %c0_i32 = arith.constant 0 : i32
    %c0_i32_0 = arith.constant 0 : i32
    %c0_i32_1 = arith.constant 0 : i32
    return %c0_i32, %c0_i32_0 : i32, i32
  }
  func.func @transform_2(%arg0: i32, %arg1: i32) -> (i32, i32) {
    %c0_i32 = arith.constant 0 : i32
    %c0_i32_0 = arith.constant 0 : i32
    %c0_i32_1 = arith.constant 0 : i32
    return %c0_i32, %c0_i32_0 : i32, i32
  }
  func.func @transform_3(%arg0: i32, %arg1: i32) -> (i32, i32) {
    %c0_i32 = arith.constant 0 : i32
    %c0_i32_0 = arith.constant 0 : i32
    %c0_i32_1 = arith.constant 0 : i32
    return %c0_i32, %c0_i32_0 : i32, i32
  }
  func.func @transform_4(%arg0: i32, %arg1: i32) -> (i32, i32) {
    %c0_i32 = arith.constant 0 : i32
    %c0_i32_0 = arith.constant 0 : i32
    %c0_i32_1 = arith.constant 0 : i32
    return %c0_i32, %c0_i32_0 : i32, i32
  }
  func.func @transform_5(%arg0: i32, %arg1: i32) -> (i32, i32) {
    %c0_i32 = arith.constant 0 : i32
    %c0_i32_0 = arith.constant 0 : i32
    %c0_i32_1 = arith.constant 0 : i32
    return %c0_i32, %c0_i32_0 : i32, i32
  }
  func.func @transform_6(%arg0: i32, %arg1: i32) -> (i32, i32) {
    %c0_i32 = arith.constant 0 : i32
    %c0_i32_0 = arith.constant 0 : i32
    %c0_i32_1 = arith.constant 0 : i32
    return %c0_i32, %c0_i32_0 : i32, i32
  }
  func.func @transform_7(%arg0: i32, %arg1: i32) -> (i32, i32, i32) {
    %c0_i32 = arith.constant 0 : i32
    %c0_i32_0 = arith.constant 0 : i32
    return %arg0, %arg1, %c0_i32 : i32, i32, i32
  }
}

</mosaic_0001>

<bundles_post_ra>
// kernel: tpu_custom_call.1
= control target key start
LH: loop header
LB: loop body
LE: loop exit
PB: predicated region body
PF: predicated region fallthrough
CT: control target
= control target key end

     0   :  { %s2104_s0 = inlined_call_operand.hbm [shape: f32[2,32,128], index: 0, kind: input, shape index: {}]   ;;  %s2105_s1 = inlined_call_operand.hbm [shape: f32[384,128], index: 1, kind: input, shape index: {}]   ;;  %s2106_s2 = inlined_call_operand.vmem [shape: f32[1,128], index: 2, kind: input, shape index: {}]   ;;  %s2107_s3 = inlined_call_operand.hbm [shape: f32[384,128], index: 3, kind: input, shape index: {}]   ;;  %s2108_s4 = inlined_call_operand.vmem [shape: f32[1,128], index: 4, kind: input, shape index: {}]   ;;  %s2109_s5 = inlined_call_operand.hbm [shape: f32[128,128], index: 5, kind: input, shape index: {}]   ;;  %s2110_s6 = inlined_call_operand.vmem [shape: f32[1,128], index: 6, kind: input, shape index: {}]   ;;  %s2111_s7 = inlined_call_operand.hbm [shape: f32[2,16,128], index: 7, kind: output, shape index: {}]  }
   0x1   :  { %2119 = sst [smem:[#allocation23_spill]] %s2107_s3 }
   0x2   :  { %12 = vsyncpa [#allocation5], 0 }
   0x3   :  { %13 = vsyncpa [#allocation8], 0 }
   0x4   :  { %14 = vsyncpa [#allocation6], 0 }
   0x5   :  { %16 = vsyncpa [#allocation6 + $0x1], 0  ;;  %s1818_s24 = smov 0   ;;  %s1820_s25 = smov 0  }
   0x6   :  { %s1822_s26 = smov 0   ;;  %s1824_s27 = smov 0  }
   0x7   :  { %s1826_s28 = smov 0   ;;  %s1828_s29 = smov 0  }
   0x8 LB: > { %2120 = sst [smem:[#allocation19_spill]] %s1752_s26  ;;  %s1053_s30 = sadd.s32 4294967295, %s1764_s29   ;;  %s1764_s29 = sphi %s1828_s29, %s22_s29   ;;  %s1760_s28 = sphi %s1826_s28, %s2138_s28   ;;  %s1756_s27 = sphi %s1824_s27, %s2137_s27   ;;  %s1752_s26 = sphi %s1822_s26, %s2136_s26   ;;  %s1748_s25 = sphi %s1820_s25, %s2140_s25   ;;  %s1744_s24 = sphi %s1818_s24, %s2139_s24  }
   0x9   : > { %2121 = sst [smem:[#allocation20_spill]] %s1760_s28  ;;  %s1054_s8 = sadd.s32 4294967294, %s1764_s29  }
   0xa   : > { %s34_s9 = sadd.s32 1, %s1760_s28  ;;  %s169_s10 = sadd.s32 1, %s1752_s26 }
   0xb   : > { %p36_p0 = scmp.ge.s32.totalorder %s34_s9, 2  ;;  %p179_p1 = scmp.ne.s32.totalorder %s1752_s26, %s1748_s25 }
   0xc   : > { %p180_p2 = scmp.eq.s32.totalorder %s1053_s30, 1  ;;  %p185_p3 = scmp.ne.s32.totalorder %s1748_s25, %s1744_s24 }
   0xd   : > { %s2142_s9 = smov (%p36_p0, %s34_s9), 0  ;;  %p186_p5 = scmp.eq.s32.totalorder %s1054_s8, 1 }
   0xe   : > { %2122 = sst [smem:[#allocation21_spill]] %s2142_s9  ;;  %p1858_p4 = por %p180_p2, %p179_p1 }
   0xf   : > { %s164_s12 = ssub.s32 %s1760_s28, %s2142_s9  ;;  %p1055_p6 = scmp.ge.s32.totalorder %s1764_s29, 1 }
  0x10   : > { %s2123_s11 = scalar_select %p1858_p4, 1, 0 }
  0x11   : > { %p167_p7 = scmp.eq.s32.totalorder %s164_s12, 0  ;;  %p1865_p8 = por %p186_p5, %p185_p3 }
  0x12   : > { %p193_p9 = scmp.lt.s32.totalorder %s1764_s29, 3  ;;  %p1877_p11 = scmp.eq.s32.totalorder %s1053_s30, 0 }
  0x13   : > { %s2124_s13 = scalar_select %p1865_p8, 1, 0 }
  0x14   : > { %s1871_s14 = scalar_select %p167_p7, %s1752_s26, %s169_s10  }
  0x15   : > { %p1873_p10 = pnand %p1055_p6, %p193_p9  ;;  %s1766_s17 = smov [#allocation7]  }
  0x16   : > { %2125 = sst [smem:[#allocation22_spill]] %s1871_s14  ;;  %s221_s18 = sshll.u32 %s1766_s17, 4  ;;  %s222_s18 = int_to_ptr.vmem [resolvable:$true] %s221_s18 }
  0x17   : > { %s2126_s15 = scalar_select %p1873_p10, 1, 0 }
  0x18   : > { %s2127_s16 = scalar_select %p1877_p11, 1, 0 }
  0x19   : > { %p1488_p12 = pneg %p1873_p10  ;;  %s1767_s20 = smov [#allocation4]  }
  0x1a   : > { %s205_s21 = sshll.u32 %s1767_s20, 4  ;;  %s2129_s3 = sld [smem:[#allocation23_spill]]  ;;  %s206_s21 = int_to_ptr.vmem [resolvable:$true] %s205_s21 }
  0x1b   : > { %p1885_p13 = pnand %p1877_p11, %p1488_p12 }
  0x1d   : > { %p1897_p1 = pneg %p1885_p13 }
  0x20   : > { %s1568_s30 = scalar_lea.hbm %s2129_s3, 6144 }
  0x21   : > { %p1569_p0 = scmp.ne.s32.totalorder %s2129_s3, %s1568_s30  ;;  %p1575_p5 = scmp.lt.u32.totalorder %s1568_s30, %s2129_s3 }
  0x23   : > { %p1571_p2 = pnand %p1897_p1, %p1569_p0 }
  0x25   : > { %p1572_p3 = pneg %p1571_p2 }
  0x27   : > { %p1577_p6 = pnand %p1575_p5, %p1572_p3 }
  0x29   : > { %1580 = shalt.err (!%p1577_p6)
}
  0x2a   : > { %s1581_s20 = scalar_lea.vmem %s222_s18, 6144  ;;  %p1589_p8 = scmp.lt.s32.totalorder %s222_s18, %s222_s18 }
  0x2b   : > { %p1582_p7 = scmp.ne.s32.totalorder %s222_s18, %s1581_s20  ;;  %p1590_p4 = scmp.lt.s32.totalorder %s1581_s20, %s1581_s20 }
  0x2d   : > { %p1584_p9 = pnand %p1582_p7, %p1897_p1  ;;  %p1591_p11 = por %p1590_p4, %p1589_p8 }
  0x2f   : > { %p1585_p12 = pneg %p1584_p9 }
  0x31   : > { %p1592_p10 = pnand %p1591_p11, %p1585_p12 }
  0x33   : > { %1595 = shalt.err (!%p1592_p10)
}
  0x34   : > { %s1768_s22 = smov 128   ;;  %s1769_s23 = smov 8  }
  0x35   : > { %1494 = dma.hbm_to_vmem [thread:$0]  (!%p1885_p13), %s2129_s3, 6144, %s222_s18, [#allocation8], %s1768_s22, %s1768_s22, %s1769_s23  }
  0x36   : > { %s1596_s17 = scalar_lea.hbm %s2105_s1, 6144 }
  0x37   : > { %p1597_p4 = scmp.ne.s32.totalorder %s2105_s1, %s1596_s17  ;;  %p1603_p11 = scmp.lt.u32.totalorder %s1596_s17, %s2105_s1 }
  0x39   : > { %p1599_p8 = pnand %p1597_p4, %p1897_p1 }
  0x3b   : > { %p1600_p10 = pneg %p1599_p8 }
  0x3d   : > { %p1605_p0 = pnand %p1603_p11, %p1600_p10 }
  0x3f   : > { %1608 = shalt.err (!%p1605_p0)
}
  0x40   : > { %s1609_s9 = scalar_lea.vmem %s206_s21, 6144  ;;  %p1617_p6 = scmp.lt.s32.totalorder %s206_s21, %s206_s21 }
  0x41   : > { %p1610_p2 = scmp.ne.s32.totalorder %s206_s21, %s1609_s9  ;;  %p1618_p7 = scmp.lt.s32.totalorder %s1609_s9, %s1609_s9 }
  0x43   : > { %p1612_p3 = pnand %p1610_p2, %p1897_p1  ;;  %p1619_p9 = por %p1618_p7, %p1617_p6 }
  0x45   : > { %p1613_p5 = pneg %p1612_p3 }
  0x47   : > { %p1620_p12 = pnand %p1619_p9, %p1613_p5 }
  0x49   : > { %1623 = shalt.err (!%p1620_p12)
}
  0x4a   : > { %1491 = dma.hbm_to_vmem [thread:$0]  (!%p1885_p13), %s2105_s1, 6144, %s206_s21, [#allocation5], %s1768_s22, %s1768_s22, %s1769_s23  }
  0x4b   : > { %s1770_s14 = smov [#allocation9]   ;;  %s1624_s10 = scalar_lea.hbm %s2109_s5, 2048 }
  0x4c   : > { %s237_s18 = sshll.u32 %s1770_s14, 4  ;;  %p1625_p4 = scmp.ne.s32.totalorder %s2109_s5, %s1624_s10  ;;  %s238_s18 = int_to_ptr.vmem [resolvable:$true] %s237_s18 }
  0x4d   : > { %p1631_p11 = scmp.lt.u32.totalorder %s1624_s10, %s2109_s5 }
  0x4e   : > { %p1627_p8 = pnand %p1625_p4, %p1897_p1 }
  0x50   : > { %p1628_p10 = pneg %p1627_p8 }
  0x52   : > { %p1633_p0 = pnand %p1631_p11, %p1628_p10 }
  0x54   : > { %1636 = shalt.err (!%p1633_p0)
}
  0x55   : > { %s1637_s21 = scalar_lea.vmem %s238_s18, 2048  ;;  %p1645_p6 = scmp.lt.s32.totalorder %s238_s18, %s238_s18 }
  0x56   : > { %p1638_p2 = scmp.ne.s32.totalorder %s238_s18, %s1637_s21  ;;  %p1646_p7 = scmp.lt.s32.totalorder %s1637_s21, %s1637_s21 }
  0x58   : > { %p1640_p3 = pnand %p1638_p2, %p1897_p1  ;;  %p1647_p9 = por %p1646_p7, %p1645_p6 }
  0x5a   : > { %p1641_p5 = pneg %p1640_p3 }
  0x5c   : > { %p1648_p12 = pnand %p1647_p9, %p1641_p5 }
  0x5e   : > { %1651 = shalt.err (!%p1648_p12)
}
  0x5f   : > { %1497 = dma.hbm_to_vmem [thread:$0]  (!%p1885_p13), %s2109_s5, 2048, %s238_s18, [#allocation8], %s1768_s22, %s1768_s22, %s1769_s23  }
  0x60   : > { %p2131_p4 = scmp.ne.s32.totalorder %s2126_s15, 0 }
  0x61   : > { %p2132_p1 = scmp.ne.s32.totalorder (!%p2131_p4), %s2127_s16, 0 }
  0x62   : > { %256 = sbr.rel (%p2131_p4) target bundleno = 671 (0x29f), region = 44 }
  0x69   : > { %1729 = dma.done.wait (%p2132_p1), [#allocation5], 6144  }
  0x6a   : > { %1731 = vsyncadd (%p2132_p1), [#allocation5], 4294961152 }
  0x6b   : > { %1733 = dma.done.wait (%p2132_p1), [#allocation8], 8192  }
  0x6c   : > { %1735 = vsyncadd (%p2132_p1), [#allocation8], 4294959104  ;;  %s286_s19 = sand.u32 1, %s1748_s25   ;;  %s1075_s12 = sshll.u32 %s1756_s27, 9 }
  0x6d   : > { %s1063_s15 = sshll.u32 %s286_s19, 4  ;;  %s294_s28 = scalar_lea.hbm %s2104_s0, %s1075_s12 }
  0x6e   : > { %s1771_s14 = smov [#allocation2]   ;;  %s1652_s30 = scalar_lea.hbm %s294_s28, 512 }
  0x6f   : > { %s302_s18 = sshll.u32 %s1771_s14, 4  ;;  %p1653_p13 = scmp.ne.s32.totalorder %s294_s28, %s1652_s30  ;;  %s303_s18 = int_to_ptr.vmem [resolvable:$true] %s302_s18 }
  0x70   : > { %s1654_s16 = scalar_lea.hbm %s2104_s0, 1024  ;;  %p1655_p8 = scmp.lt.u32.totalorder %s294_s28, %s2104_s0 }
  0x71   : > { %p1656_p10 = scmp.lt.u32.totalorder %s1654_s16, %s1652_s30  ;;  %p1658_p0 = scmp.lt.u32.totalorder %s1652_s30, %s294_s28 }
  0x73   : > { %p1657_p11 = por %p1656_p10, %p1655_p8 }
  0x75   : > { %p1659_p2 = por %p1658_p0, %p1657_p11 }
  0x77   : > { %p1660_p3 = pnand %p1659_p2, %p1653_p13 }
  0x79   : > { %1663 = shalt.err (!%p1660_p3)  }
  0x7a   : > { %s1664_s9 = scalar_lea.vmem %s303_s18, 512  ;;  %p1669_p6 = scmp.lt.s32.totalorder %s303_s18, %s303_s18 }
  0x7b   : > { %p1665_p5 = scmp.ne.s32.totalorder %s303_s18, %s1664_s9  ;;  %p1670_p7 = scmp.lt.s32.totalorder %s1664_s9, %s1664_s9 }
  0x7d   : > { %p1671_p9 = por %p1670_p7, %p1669_p6 }
  0x7f   : > { %p1672_p12 = pnand %p1671_p9, %p1665_p5 }
  0x81   : > { %1675 = shalt.err (!%p1672_p12)  }
  0x82   : > { %305 = dma.hbm_to_vmem [thread:$0]  %s294_s28, 512, %s303_s18, [#allocation3] }
  0x83   : > { %s1981_s21 = scalar_lea.vmem [#allocation10], %s1063_s15 }
  0x84   : > { %1736 = dma.done.wait [#allocation3], 512 }
  0x85   : > { %1737 = vsyncadd [#allocation3], 4294966784  ;;  %v1772_v0 = vmov 0.0|0.0   ;;  %vm1773_vm0 = vmmov 0   ;;  %v1774_v1 = vmov 0.0   ;;  %v347_v2 = vld [vmem:[#allocation4 + $0x80] sm:$0xff] }
  0x86   : > { %1354 = vmatprep.subr.bf16.mxu1 %v1772_v0  ;;  %1243 = vmatprep.mubr.msk.f32.mxu1 %vm1773_vm0, %v1774_v1  ;;  %v348_v3 = vld [vmem:[#allocation4 + $0x88] sm:$0xff]  ;;  %v331_v4 = vld [vmem:[#allocation4] sm:$0xff]  ;;  %v349_v7 = vld [vmem:[#allocation4 + $0x90] sm:$0xff]  ;;  %vm317_vm1 = vcmask 1045504   ;;  %vm325_vm2 = vcmask 1043456   ;;  %s1076_s28 = sshll.u32 %s1756_s27, 8 }
  0x87   : > { %v1322_v5 = vpack.c.bf16 %v348_v3, %v347_v2  ;;  %v332_v6 = vld [vmem:[#allocation4 + $0x8] sm:$0xff]  ;;  %v350_v8 = vld [vmem:[#allocation4 + $0x98] sm:$0xff]  ;;  %v333_v11 = vld [vmem:[#allocation4 + $0x10] sm:$0xff]  ;;  %s950_s14 = sshll.u32 %s1981_s21, 4  ;;  %s2050_s8 = scalar_lea.hbm %s2111_s7, %s1076_s28  ;;  %s2052_s14 = int_to_ptr.vmem [resolvable:$true] %s950_s14 }
  0x88   : > { %v1324_v9 = vpack.c.bf16 %v332_v6, %v331_v4  ;;  %v1326_v10 = vpack.c.bf16 %v350_v8, %v349_v7  ;;  %v334_v12 = vld [vmem:[#allocation4 + $0x18] sm:$0xff]  ;;  %v363_v13 = vld [vmem:[#allocation4 + $0x100] sm:$0xff]  ;;  %v364_v14 = vld [vmem:[#allocation4 + $0x108] sm:$0xff]  ;;  %s2058_s10 = scalar_lea.sflag [#allocation6], %s286_s19  ;;  %s1676_s27 = scalar_lea.vmem %s2052_s14, 256 }
  0x89   : > { %1323 = vmatprep.subr.bf16.mxu0 %v1322_v5  ;;  %v351_v15 = vld [vmem:[#allocation4 + $0xa0] sm:$0xff]  ;;  %v352_v16 = vld [vmem:[#allocation4 + $0xa8] sm:$0xff]  ;;  %v1328_v17 = vpack.c.bf16 %v334_v12, %v333_v11  ;;  %v1355_v18 = vpack.c.bf16 %v364_v14, %v363_v13  ;;  %v365_v19 = vld [vmem:[#allocation4 + $0x110] sm:$0xff]  ;;  %p1677_p4 = scmp.ne.s32.totalorder %s2052_s14, %s1676_s27  ;;  %p2133_p1 = scmp.ne.s32.totalorder %s2123_s11, 0 }
  0x8a   : > { %1325 = vmatpush3.bf16.msra.mxu0 %v1324_v9  ;;  %v1330_v20 = vpack.c.bf16 %v352_v16, %v351_v15  ;;  %v335_v21 = vld [vmem:[#allocation4 + $0x20] sm:$0xff]  ;;  %v336_v22 = vld [vmem:[#allocation4 + $0x28] sm:$0xff]  ;;  %v366_v23 = vld [vmem:[#allocation4 + $0x118] sm:$0xff]  ;;  %s1775_s16 = smov [#allocation10]  }
  0x8b   : > { %1327 = vmatprep.subr.bf16.mxu0 %v1326_v10  ;;  %1356 = vmatpush3.bf16.msra.mxu1 %v1355_v18  ;;  %v1358_v24 = vpack.c.bf16 %v366_v23, %v365_v19  ;;  %v353_v25 = vld [vmem:[#allocation4 + $0xb0] sm:$0xff]  ;;  %v354_v26 = vld [vmem:[#allocation4 + $0xb8] sm:$0xff]  ;;  %v367_v27 = vld [vmem:[#allocation4 + $0x120] sm:$0xff]  ;;  %v1332_v29 = vpack.c.bf16 %v336_v22, %v335_v21  ;;  %p1678_p13 = pnand %p1677_p4, %p2133_p1  ;;  %s1680_s17 = sshll.u32 %s1775_s16, 4  ;;  %s1681_s17 = int_to_ptr.vmem [resolvable:$false] %s1680_s17 }
  0x8c   : > { %1357 = vmatprep.subr.bf16.mxu1 %v1772_v0  ;;  %v368_v28 = vld [vmem:[#allocation4 + $0x128] sm:$0xff]  ;;  %v1334_v30 = vpack.c.bf16 %v354_v26, %v353_v25  ;;  %v337_v31 = vld [vmem:[#allocation4 + $0x30] sm:$0xff]  ;;  %v338_v32 = vld [vmem:[#allocation4 + $0x38] sm:$0xff]  ;;  %s1682_s20 = scalar_lea.vmem %s1681_s17, 512  ;;  %p1683_p10 = scmp.lt.s32.totalorder %s2052_s14, %s1681_s17 }
  0x8d   : > { %v1361_v33 = vpack.c.bf16 %v368_v28, %v367_v27  ;;  %v355_v34 = vld [vmem:[#allocation4 + $0xc0] sm:$0xff]  ;;  %v356_v35 = vld [vmem:[#allocation4 + $0xc8] sm:$0xff]  ;;  %v369_v36 = vld [vmem:[#allocation4 + $0x130] sm:$0xff]  ;;  %v1336_v38 = vpack.c.bf16 %v338_v32, %v337_v31  ;;  %p1679_p8 = pneg %p1678_p13  ;;  %p1684_p11 = scmp.lt.s32.totalorder %s1682_s20, %s1676_s27 }
  0x8e   : > { %1329 = vmatpush3.bf16.msra.mxu0 %v1328_v17  ;;  %v370_v37 = vld [vmem:[#allocation4 + $0x138] sm:$0xff]  ;;  %v1338_v39 = vpack.c.bf16 %v356_v35, %v355_v34  ;;  %v339_v40 = vld [vmem:[#allocation4 + $0x40] sm:$0xff]  ;;  %v340_v41 = vld [vmem:[#allocation4 + $0x48] sm:$0xff] }
  0x8f   : > { %1331 = vmatprep.subr.bf16.mxu0 %v1330_v20  ;;  %1359 = vmatpush3.bf16.msra.mxu1 %v1358_v24  ;;  %v1364_v42 = vpack.c.bf16 %v370_v37, %v369_v36  ;;  %v357_v43 = vld [vmem:[#allocation4 + $0xd0] sm:$0xff]  ;;  %v358_v44 = vld [vmem:[#allocation4 + $0xd8] sm:$0xff]  ;;  %v371_v45 = vld [vmem:[#allocation4 + $0x140] sm:$0xff]  ;;  %v1340_v49 = vpack.c.bf16 %v340_v41, %v339_v40  ;;  %p1685_p0 = por %p1684_p11, %p1683_p10 }
  0x90   : > { %1360 = vmatprep.subr.bf16.mxu1 %v1772_v0  ;;  %v372_v46 = vld [vmem:[#allocation4 + $0x148] sm:$0xff]  ;;  %v1989_v47 = vld [vmem:[#allocation2] sm:$0xff]  ;;  %v1991_v50 = vld [vmem:[#allocation2 + $0x10] sm:$0xff]  ;;  %v1342_v53 = vpack.c.bf16 %v358_v44, %v357_v43 }
  0x91   : > { %v310_v48 = vld [vmem:[#allocation2 + $0x8] sm:$0xff]  ;;  %v318_v51 = vrot.slane %v1989_v47, 2  ;;  %v341_v54 = vld [vmem:[#allocation4 + $0x50] sm:$0xff]  ;;  %v342_v55 = vld [vmem:[#allocation4 + $0x58] sm:$0xff]  ;;  %v321_v56 = vrot.slane %v1991_v50, 2  ;;  %v1367_v57 = vpack.c.bf16 %v372_v46, %v371_v45  ;;  %v327_v17 = vrot.slane %v1991_v50, 4  ;;  %p1686_p2 = pnand %p1685_p0, %p1679_p8 }
  0x92   : > { %1333 = vmatpush3.bf16.msra.mxu0 %v1332_v29  ;;  %v319_v52 = vrot.slane %v310_v48, 2  ;;  %v359_v58 = vld [vmem:[#allocation4 + $0xe0] sm:$0xff]  ;;  %v360_v59 = vld [vmem:[#allocation4 + $0xe8] sm:$0xff]  ;;  %v373_v61 = vld [vmem:[#allocation4 + $0x150] sm:$0xff]  ;;  %v1344_v4 = vpack.c.bf16 %v342_v55, %v341_v54  ;;  %v326_v16 = vrot.slane %v310_v48, 4  ;;  %v386_v31 = vrot.slane %v1989_v47, 4 }
  0x93   : > { %1335 = vmatprep.subr.bf16.mxu0 %v1334_v30  ;;  %1362 = vmatpush3.bf16.msra.mxu1 %v1361_v33  ;;  %v374_v62 = vld [vmem:[#allocation4 + $0x158] sm:$0xff]  ;;  %v1346_v6 = vpack.c.bf16 %v360_v59, %v359_v58  ;;  %v343_v7 = vld [vmem:[#allocation4 + $0x60] sm:$0xff]  ;;  %v344_v8 = vld [vmem:[#allocation4 + $0x68] sm:$0xff] }
  0x94   : > { %1363 = vmatprep.subr.bf16.mxu1 %v1772_v0  ;;  %v320_v60 = vsel %vm317_vm1, %v318_v51, %v319_v52  ;;  %v1998_v63 = vsel %vm317_vm1, %v319_v52, %v321_v56  ;;  %v2000_v3 = vld [vmem:[#allocation2 + $0x18] sm:$0xff]  ;;  %v1370_v9 = vpack.c.bf16 %v374_v62, %v373_v61  ;;  %v361_v10 = vld [vmem:[#allocation4 + $0xf0] sm:$0xff]  ;;  %v375_v14 = vld [vmem:[#allocation4 + $0x160] sm:$0xff]  ;;  %v1348_v18 = vpack.c.bf16 %v344_v8, %v343_v7 }
  0x95   : > { %v388_v2 = vrot.slane %v320_v60, 4  ;;  %v389_v5 = vrot.slane %v1998_v63, 4  ;;  %v362_v11 = vld [vmem:[#allocation4 + $0xf8] sm:$0xff]  ;;  %v323_v13 = vrot.slane %v2000_v3, 2  ;;  %v376_v15 = vld [vmem:[#allocation4 + $0x168] sm:$0xff]  ;;  %v345_v20 = vld [vmem:[#allocation4 + $0x70] sm:$0xff]  ;;  %v328_v28 = vsel %vm325_vm2, %v326_v16, %v327_v17 }
  0x96   : > { %1337 = vmatpush3.bf16.msra.mxu0 %v1336_v38  ;;  %v1350_v19 = vpack.c.bf16 %v362_v11, %v361_v10  ;;  %v346_v21 = vld [vmem:[#allocation4 + $0x78] sm:$0xff]  ;;  %v1373_v22 = vpack.c.bf16 %v376_v15, %v375_v14  ;;  %v621_v24 = vld [vmem:[#allocation7 + $0x80] sm:$0xff]  ;;  %v622_v25 = vld [vmem:[#allocation7 + $0x88] sm:$0xff]  ;;  %v329_v29 = vrot.slane %v2000_v3, 4  ;;  %v391_v40 = vrot.slane %v326_v16, 4 }
  0x97   : > { %1339 = vmatprep.subr.bf16.mxu0 %v1338_v39  ;;  %1365 = vmatpush3.bf16.msra.mxu1 %v1364_v42  ;;  %v390_v12 = vsel %vm325_vm2, %v388_v2, %v389_v5  ;;  %v324_v23 = vsel %vm317_vm1, %v321_v56, %v323_v13  ;;  %v377_v26 = vld [vmem:[#allocation4 + $0x170] sm:$0xff]  ;;  %v378_v27 = vld [vmem:[#allocation4 + $0x178] sm:$0xff]  ;;  %v1352_v30 = vpack.c.bf16 %v346_v21, %v345_v20  ;;  %v637_v32 = vld [vmem:[#allocation7 + $0x100] sm:$0xff]  ;;  %v392_v39 = vrot.slane %v328_v28, 4 }
  0x98   : > { %1366 = vmatprep.subr.bf16.mxu1 %v1772_v0  ;;  %475 = vmatprep.mubr.f32.mxu0 %v390_v12  ;;  %v638_v33 = vld [vmem:[#allocation7 + $0x108] sm:$0xff]  ;;  %v394_v34 = vrot.slane %v324_v23, 4  ;;  %v1378_v35 = vpack.c.bf16 %v622_v25, %v621_v24  ;;  %v605_v36 = vld [vmem:[#allocation7] sm:$0xff]  ;;  %v1376_v38 = vpack.c.bf16 %v378_v27, %v377_v26  ;;  %v623_v41 = vld [vmem:[#allocation7 + $0x90] sm:$0xff]  ;;  %v330_v43 = vsel %vm325_vm2, %v327_v17, %v329_v29 }
  0x99   : > { %v606_v37 = vld [vmem:[#allocation7 + $0x8] sm:$0xff]  ;;  %v624_v42 = vld [vmem:[#allocation7 + $0x98] sm:$0xff]  ;;  %v1410_v44 = vpack.c.bf16 %v638_v33, %v637_v32  ;;  %v387_v45 = vsel %vm325_vm2, %v386_v31, %v326_v16  ;;  %v639_v47 = vld [vmem:[#allocation7 + $0x110] sm:$0xff]  ;;  %v398_v51 = vrot.slane %v323_v13, 4  ;;  %v393_v55 = vsel %vm325_vm2, %v391_v40, %v392_v39 }
  0x9a   : > { %1341 = vmatpush3.bf16.msra.mxu0 %v1340_v49  ;;  %v1380_v46 = vpack.c.bf16 %v606_v37, %v605_v36  ;;  %v640_v48 = vld [vmem:[#allocation7 + $0x118] sm:$0xff]  ;;  %v395_v49 = vsel %vm325_vm2, %v389_v5, %v394_v34  ;;  %v1382_v52 = vpack.c.bf16 %v624_v42, %v623_v41  ;;  %v400_v60 = vrot.slane %v329_v29, 4  ;;  %v625_v62 = vld [vmem:[#allocation7 + $0xa0] sm:$0xff]  ;;  %v626_v63 = vld [vmem:[#allocation7 + $0xa8] sm:$0xff] }
  0x9b   : > { %1343 = vmatprep.subr.bf16.mxu0 %v1342_v53  ;;  %1368 = vmatpush3.bf16.msra.mxu1 %v1367_v57  ;;  %v607_v53 = vld [vmem:[#allocation7 + $0x10] sm:$0xff]  ;;  %v608_v54 = vld [vmem:[#allocation7 + $0x18] sm:$0xff]  ;;  %v1414_v56 = vpack.c.bf16 %v640_v48, %v639_v47  ;;  %v399_v58 = vsel %vm325_vm2, %v394_v34, %v398_v51  ;;  %v1386_v2 = vpack.c.bf16 %v626_v63, %v625_v62  ;;  %v610_v5 = vld [vmem:[#allocation7 + $0x28] sm:$0xff] }
  0x9c   : > { %1369 = vmatprep.subr.bf16.mxu1 %v1772_v0  ;;  %v1384_v57 = vpack.c.bf16 %v608_v54, %v607_v53  ;;  %v642_v8 = vld [vmem:[#allocation7 + $0x128] sm:$0xff]  ;;  %v627_v10 = vld [vmem:[#allocation7 + $0xb0] sm:$0xff]  ;;  %v628_v11 = vld [vmem:[#allocation7 + $0xb8] sm:$0xff] }
  0x9d   : > { %v1390_v12 = vpack.c.bf16 %v628_v11, %v627_v10  ;;  %v611_v13 = vld [vmem:[#allocation7 + $0x30] sm:$0xff]  ;;  %v612_v14 = vld [vmem:[#allocation7 + $0x38] sm:$0xff]  ;;  %v630_v20 = vld [vmem:[#allocation7 + $0xc8] sm:$0xff] }
  0x9e   : > { %1345 = vmatpush3.bf16.msra.mxu0 %v1344_v4  ;;  %v609_v4 = vld [vmem:[#allocation7 + $0x20] sm:$0xff]  ;;  %v643_v15 = vld [vmem:[#allocation7 + $0x130] sm:$0xff]  ;;  %v1392_v16 = vpack.c.bf16 %v612_v14, %v611_v13  ;;  %v644_v17 = vld [vmem:[#allocation7 + $0x138] sm:$0xff] }
  0x9f   : > { %1347 = vmatprep.subr.bf16.mxu0 %v1346_v6  ;;  %1371 = vmatpush3.bf16.msra.mxu1 %v1370_v9  ;;  %v641_v6 = vld [vmem:[#allocation7 + $0x120] sm:$0xff]  ;;  %v1388_v7 = vpack.c.bf16 %v610_v5, %v609_v4  ;;  %v614_v23 = vld [vmem:[#allocation7 + $0x48] sm:$0xff]  ;;  %v632_v29 = vld [vmem:[#allocation7 + $0xd8] sm:$0xff] }
  0xa0   : > { %1372 = vmatprep.subr.bf16.mxu1 %v1772_v0  ;;  %v1418_v9 = vpack.c.bf16 %v642_v8, %v641_v6  ;;  %v645_v24 = vld [vmem:[#allocation7 + $0x140] sm:$0xff]  ;;  %v646_v26 = vld [vmem:[#allocation7 + $0x148] sm:$0xff]  ;;  %v615_v31 = vld [vmem:[#allocation7 + $0x50] sm:$0xff] }
  0xa1   : > { %v1426_v27 = vpack.c.bf16 %v646_v26, %v645_v24  ;;  %v616_v32 = vld [vmem:[#allocation7 + $0x58] sm:$0xff]  ;;  %v647_v33 = vld [vmem:[#allocation7 + $0x150] sm:$0xff]  ;;  %v633_v37 = vld [vmem:[#allocation7 + $0xe0] sm:$0xff]  ;;  %v660_v24 = vrot.slane %v1774_v1, 4 }
  0xa2   : > { %1349 = vmatpush3.bf16.msra.mxu0 %v1348_v18  ;;  %v1422_v18 = vpack.c.bf16 %v644_v17, %v643_v15  ;;  %v1400_v34 = vpack.c.bf16 %v616_v32, %v615_v31  ;;  %v617_v40 = vld [vmem:[#allocation7 + $0x60] sm:$0xff]  ;;  %v618_v41 = vld [vmem:[#allocation7 + $0x68] sm:$0xff]  ;;  %v636_v47 = vld [vmem:[#allocation7 + $0xf8] sm:$0xff] }
  0xa3   : > { %1351 = vmatprep.subr.bf16.mxu0 %v1350_v19  ;;  %1374 = vmatpush3.bf16.msra.mxu1 %v1373_v22  ;;  %v629_v19 = vld [vmem:[#allocation7 + $0xc0] sm:$0xff]  ;;  %v620_v51 = vld [vmem:[#allocation7 + $0x78] sm:$0xff] }
  0xa4   : > { %1375 = vmatprep.subr.bf16.mxu1 %v1772_v0  ;;  %v396_v0 = vrot.slane %v330_v43, 4  ;;  %v1394_v21 = vpack.c.bf16 %v630_v20, %v629_v19  ;;  %v613_v22 = vld [vmem:[#allocation7 + $0x40] sm:$0xff]  ;;  %v652_v54 = vld [vmem:[#allocation7 + $0x178] sm:$0xff] }
  0xa5   : > { %v1396_v25 = vpack.c.bf16 %v614_v23, %v613_v22  ;;  %v649_v42 = vld [vmem:[#allocation7 + $0x160] sm:$0xff]  ;;  %v833_v26 = vld [vmem:[#allocation9 + $0x18] sm:$0xff] }
  0xa6   : > { %1353 = vmatpush3.bf16.msra.mxu0 %v1352_v30  ;;  %v397_v59 = vsel %vm325_vm2, %v392_v39, %v396_v0  ;;  %v401_v61 = vsel %vm325_vm2, %v396_v0, %v400_v60  ;;  %v830_v0 = vld [vmem:[#allocation9] sm:$0xff] }
  0xa7   : > { %1379 = vmatprep.subr.bf16.mxu0 %v1378_v35  ;;  %1377 = vmatpush3.bf16.msra.mxu1 %v1376_v38  ;;  %v648_v35 = vld [vmem:[#allocation7 + $0x158] sm:$0xff]  ;;  %v634_v38 = vld [vmem:[#allocation7 + $0xe8] sm:$0xff] }
  0xa8   : > { %1411 = vmatprep.subr.bf16.mxu1 %v1410_v44  ;;  %v1430_v36 = vpack.c.bf16 %v648_v35, %v647_v33  ;;  %v1402_v39 = vpack.c.bf16 %v634_v38, %v633_v37 }
  0xa9   : > { %476 = vmatmul.mubr.f32.vlgmr.msra.gmra.mrb[0].mxu0 %v387_v45 }
  0xaa   : > { %480 = vmatprep.mubr.f32.mxu0 %v395_v49  ;;  %1381 = vmatpush3.bf16.msra.mxu0 %v1380_v46  ;;  %v635_v46 = vld [vmem:[#allocation7 + $0xf0] sm:$0xff] }
  0xab   : > { %1244 = vmatmul.mubr.f32.vlgmr.msra.gmra.mrb[0].mxu1 %v393_v55  ;;  %1383 = vmatprep.subr.bf16.mxu0 %v1382_v52  ;;  %v1406_v48 = vpack.c.bf16 %v636_v47, %v635_v46  ;;  %v619_v49 = vld [vmem:[#allocation7 + $0x70] sm:$0xff]  ;;  %v838_v46 = vld [vmem:[#allocation9 + $0x40] sm:$0xff]  ;;  %v839_v47 = vld [vmem:[#allocation9 + $0x48] sm:$0xff] }
  0xac   : > { %1246 = vmatprep.mubr.msk.f32.mxu1 %vm1773_vm0, %v1774_v1  ;;  %1413 = vmatpush3.bf16.msra.mxu1 %v1410_v44  ;;  %v650_v44 = vld [vmem:[#allocation7 + $0x168] sm:$0xff]  ;;  %v651_v52 = vld [vmem:[#allocation7 + $0x170] sm:$0xff]  ;;  %v1408_v53 = vpack.c.bf16 %v620_v51, %v619_v49  ;;  %v841_v51 = vld [vmem:[#allocation9 + $0x58] sm:$0xff] }
  0xad   : > { %481 = vmatmul.mubr.f32.gmra.mrb[2].mxu0 %v328_v28  ;;  %1415 = vmatprep.subr.bf16.mxu1 %v1414_v56  ;;  %v631_v28 = vld [vmem:[#allocation7 + $0xd0] sm:$0xff]  ;;  %v1434_v45 = vpack.c.bf16 %v650_v44, %v649_v42  ;;  %v1438_v55 = vpack.c.bf16 %v652_v54, %v651_v52  ;;  %v837_v44 = vld [vmem:[#allocation9 + $0x38] sm:$0xff]  ;;  %v843_v54 = vld [vmem:[#allocation9 + $0x68] sm:$0xff] }
  0xae   : > { %485 = vmatprep.mubr.f32.mxu0 %v399_v58  ;;  %1385 = vmatpush3.bf16.msra.mxu0 %v1384_v57  ;;  %v1398_v30 = vpack.c.bf16 %v632_v29, %v631_v28  ;;  %v840_v49 = vld [vmem:[#allocation9 + $0x50] sm:$0xff] }
  0xaf   : > { %1247 = vmatmul.mubr.f32.gmra.mrb[2].mxu1 %v397_v59  ;;  %1387 = vmatprep.subr.bf16.mxu0 %v1386_v2  ;;  %v1066_v2 = vld [vmem:[%s2106_s2] ss:$0 sm:$0xff]  ;;  %v1462_v52 = vpack.c.bf16 %v841_v51, %v840_v49 }
  0xb0   : > { %1249 = vmatprep.mubr.msk.f32.mxu1 %vm1773_vm0, %v1774_v1  ;;  %1417 = vmatpush3.bf16.msra.mxu1 %v1414_v56  ;;  %v831_v56 = vld [vmem:[#allocation9 + $0x8] sm:$0xff] }
  0xb1   : > { %486 = vmatmul.mubr.f32.gmra.mrb[4].mxu0 %v330_v43  ;;  %1419 = vmatprep.subr.bf16.mxu1 %v1418_v9  ;;  %v1404_v43 = vpack.c.bf16 %v618_v41, %v617_v40  ;;  %v1442_v57 = vpack.c.bf16 %v831_v56, %v830_v0  ;;  %v834_v40 = vld [vmem:[#allocation9 + $0x20] sm:$0xff]  ;;  %v835_v41 = vld [vmem:[#allocation9 + $0x28] sm:$0xff]  ;;  %v844_v0 = vld [vmem:[#allocation9 + $0x70] sm:$0xff] }
  0xb2   : > { %1389 = vmatpush3.bf16.msra.mxu0 %v1388_v7  ;;  %v1450_v42 = vpack.c.bf16 %v835_v41, %v834_v40  ;;  %v845_v56 = vld [vmem:[#allocation9 + $0x78] sm:$0xff] }
  0xb3   : > { %1250 = vmatmul.mubr.f32.gmra.mrb[4].mxu1 %v401_v61  ;;  %1391 = vmatprep.subr.bf16.mxu0 %v1390_v12 }
  0xb4   : > { %1421 = vmatpush3.bf16.msra.mxu1 %v1418_v9 }
  0xb5   : > { %1423 = vmatprep.subr.bf16.mxu1 %v1422_v18 }
  0xb6   : > { %1393 = vmatpush3.bf16.msra.mxu0 %v1392_v16 }
  0xb7   : > { %1395 = vmatprep.subr.bf16.mxu0 %v1394_v21 }
  0xb8   : > { %1425 = vmatpush3.bf16.msra.mxu1 %v1422_v18  ;;  %v597_v18 = vrot.slane %v1774_v1, 2 }
  0xb9   : > { %1427 = vmatprep.subr.bf16.mxu1 %v1426_v27 }
  0xba   : > { %1397 = vmatpush3.bf16.msra.mxu0 %v1396_v25  ;;  %v832_v25 = vld [vmem:[#allocation9 + $0x10] sm:$0xff] }
  0xbb   : > { %1399 = vmatprep.subr.bf16.mxu0 %v1398_v30  ;;  %v1446_v35 = vpack.c.bf16 %v833_v26, %v832_v25 }
  0xbc   : > { %1429 = vmatpush3.bf16.msra.mxu1 %v1426_v27 }
  0xbd   : > { %1431 = vmatprep.subr.bf16.mxu1 %v1430_v36 }
  0xbe   : > { %1401 = vmatpush3.bf16.msra.mxu0 %v1400_v34 }
  0xbf   : > { %1403 = vmatprep.subr.bf16.mxu0 %v1402_v39 }
  0xc0   : > { %1433 = vmatpush3.bf16.msra.mxu1 %v1430_v36 }
  0xc1   : > { %1435 = vmatprep.subr.bf16.mxu1 %v1434_v45 }
  0xc2   : > { %1405 = vmatpush3.bf16.msra.mxu0 %v1404_v43  ;;  %v836_v43 = vld [vmem:[#allocation9 + $0x30] sm:$0xff] }
  0xc3   : > { %1407 = vmatprep.subr.bf16.mxu0 %v1406_v48  ;;  %v1458_v48 = vpack.c.bf16 %v839_v47, %v838_v46 }
  0xc4   : > { %1437 = vmatpush3.bf16.msra.mxu1 %v1434_v45  ;;  %v1454_v45 = vpack.c.bf16 %v837_v44, %v836_v43 }
  0xc5   : > { %1439 = vmatprep.subr.bf16.mxu1 %v1438_v55 }
  0xc6   : > { %1409 = vmatpush3.bf16.msra.mxu0 %v1408_v53  ;;  %v842_v53 = vld [vmem:[#allocation9 + $0x60] sm:$0xff] }
  0xc7   : > { %1443 = vmatprep.subr.bf16.mxu0 %v1442_v57 }
  0xc8   : > { %1441 = vmatpush3.bf16.msra.mxu1 %v1438_v55  ;;  %v1466_v55 = vpack.c.bf16 %v843_v54, %v842_v53 }
 0x17c   : > { %v1109_v58 = vpop.f32.mrb[0].mxu0 }
 0x17d   : > { %v1110_v59 = vpop.f32.mrb[1].mxu0 }
 0x17e   : > { %v557_v60 = vpop.f32.mrb[0].mxu1 }
 0x17f   : > { %v1245_v61 = vpop.f32.mrb[1].mxu1  ;;  %v1067_v60 = vld [vmem:[%s2108_s4] ss:$0 sm:$0xff] }
 0x180   : > { %v1112_v62 = vpop.f32.mrb[2].mxu0 }
 0x181   : > { %v1113_v63 = vpop.f32.mrb[3].mxu0 }
 0x182   : > { %v1114_v4 = vadd.f32 %v1113_v63, %v1112_v62  ;;  %v562_v5 = vpop.f32.mrb[2].mxu1 }
 0x183   : > { %v1248_v6 = vpop.f32.mrb[3].mxu1 }
 0x184   : > { %v1115_v7 = vpop.f32.mrb[4].mxu0  ;;  %v483_v8 = vadd.f32 %v1114_v4, %v1066_v2 }
 0x185   : > { %v1116_v9 = vpop.f32.mrb[5].mxu0 }
 0x186   : > { %v563_v10 = vadd.f32 %v562_v5, %v483_v8  ;;  %v1117_v11 = vadd.f32 %v1116_v9, %v1115_v7  ;;  %v567_v12 = vpop.f32.mrb[4].mxu1 }
 0x187   : > { %v1251_v13 = vpop.f32.mrb[5].mxu1 }
 0x188   : > { %v572_v14 = vmax.f32 %v563_v10, 0.0  ;;  %v488_v15 = vadd.f32 %v1117_v11, %v1066_v2 }
 0x18a   : > { %v598_v16 = vrot.slane %v572_v14, 2  ;;  %v568_v17 = vadd.f32 %v567_v12, %v488_v15  ;;  %v602_v20 = vrot.slane %v572_v14, 4 }
 0x18c   : > { %v573_v19 = vmax.f32 %v568_v17, 0.0  ;;  %v599_v23 = vsel %vm317_vm1, %v597_v18, %v598_v16  ;;  %v665_v33 = vrot.slane %v602_v20, 4  ;;  %v661_v39 = vsel %vm325_vm2, %v660_v24, %v602_v20 }
 0x18d   : > { %v662_v31 = vrot.slane %v599_v23, 4 }
 0x18e   : > { %v600_v21 = vrot.slane %v573_v19, 2  ;;  %v603_v22 = vrot.slane %v573_v19, 4 }
 0x190   : > { %v668_v27 = vrot.slane %v600_v21, 4  ;;  %v670_v28 = vrot.slane %v603_v22, 4  ;;  %v601_v29 = vsel %vm317_vm1, %v598_v16, %v600_v21  ;;  %v604_v30 = vsel %vm325_vm2, %v602_v20, %v603_v22 }
 0x191   : > { %v663_v32 = vrot.slane %v601_v29, 4  ;;  %v666_v34 = vrot.slane %v604_v30, 4 }
 0x193   : > { %v664_v36 = vsel %vm325_vm2, %v662_v31, %v663_v32  ;;  %v667_v37 = vsel %vm325_vm2, %v665_v33, %v666_v34  ;;  %v671_v38 = vsel %vm325_vm2, %v666_v34, %v670_v28  ;;  %v669_v1 = vsel %vm325_vm2, %v663_v32, %v668_v27 }
 0x194   : > { %742 = vmatprep.mubr.f32.mxu0 %v664_v36  ;;  %1284 = vmatprep.mubr.f32.mxu1 %v667_v37 }
 0x195   : > { %743 = vmatmul.mubr.f32.vlgmr.msra.gmra.mrb[6].mxu0 %v661_v39  ;;  %1285 = vmatmul.mubr.f32.vlgmr.msra.gmra.mrb[6].mxu1 %v671_v38 }
 0x196   : > { %1445 = vmatpush3.bf16.msra.mxu0 %v1442_v57  ;;  %747 = vmatprep.mubr.f32.mxu0 %v669_v1 }
 0x197   : > { %1447 = vmatprep.subr.bf16.mxu0 %v1446_v35 }
 0x199   : > { %748 = vmatmul.mubr.f32.gmra.mrb[8].mxu0 %v604_v30 }
 0x19a   : > { %1449 = vmatpush3.bf16.msra.mxu0 %v1446_v35  ;;  %1319 = vmatprep.mubr.f32.mxu0 %v1991_v50  ;;  %v1470_v50 = vpack.c.bf16 %v845_v56, %v844_v0 }
 0x19b   : > { %1451 = vmatprep.subr.bf16.mxu0 %v1450_v42 }
 0x19e   : > { %1453 = vmatpush3.bf16.msra.mxu0 %v1450_v42 }
 0x19f   : > { %1455 = vmatprep.subr.bf16.mxu0 %v1454_v45 }
 0x1a2   : > { %1457 = vmatpush3.bf16.msra.mxu0 %v1454_v45 }
 0x1a3   : > { %1459 = vmatprep.subr.bf16.mxu0 %v1458_v48 }
 0x1a6   : > { %1461 = vmatpush3.bf16.msra.mxu0 %v1458_v48 }
 0x1a7   : > { %1463 = vmatprep.subr.bf16.mxu0 %v1462_v52 }
 0x1aa   : > { %1465 = vmatpush3.bf16.msra.mxu0 %v1462_v52 }
 0x1ab   : > { %1467 = vmatprep.subr.bf16.mxu0 %v1466_v55 }
 0x1ae   : > { %1469 = vmatpush3.bf16.msra.mxu0 %v1466_v55 }
 0x1af   : > { %1471 = vmatprep.subr.bf16.mxu0 %v1470_v50 }
 0x1b2   : > { %1473 = vmatpush3.bf16.msra.mxu0 %v1470_v50 }
 0x1b5   : > { %1320 = vmatmul.mubr.f32.vlgmr.msra.gmra.mrb[10].mxu0 %v2000_v3  ;;  %v1068_v3 = vld [vmem:[%s2110_s6] ss:$0 sm:$0xff] }
 0x268   : > { %v1169_v57 = vpop.f32.mrb[6].mxu0  ;;  %v1286_v58 = vpop.f32.mrb[6].mxu1 }
 0x269   : > { %v1170_v59 = vpop.f32.mrb[7].mxu0  ;;  %v819_v61 = vpop.f32.mrb[7].mxu1 }
 0x26a   : > { %v1171_v62 = vadd.f32 %v1170_v59, %v1169_v57 }
 0x26c   : > { %v745_v63 = vadd.f32 %v1171_v62, %v1067_v60  ;;  %v1172_v2 = vpop.f32.mrb[8].mxu0 }
 0x26d   : > { %v1173_v4 = vpop.f32.mrb[9].mxu0 }
 0x26e   : > { %v820_v5 = vadd.f32 %v819_v61, %v745_v63  ;;  %v1174_v6 = vadd.f32 %v1173_v4, %v1172_v2 }
 0x270   : > { %v750_v7 = vadd.f32 %v1174_v6, %v1067_v60  ;;  %v828_v13 = vmax.f32 %v820_v5, 0.0 }
 0x272   : > { %v825_v8 = vadd.f32 %v1286_v58, %v750_v7 }
 0x274   : > { %v829_v10 = vmax.f32 %v825_v8, 0.0 }
 0x288   : > { %v1321_v9 = vpop.f32.mrb[10].mxu0 }
 0x289   : > { %v925_v11 = vadd.f32 %v1321_v9, %v1068_v3  ;;  %v919_v12 = vpop.f32.mrb[11].mxu0 }
 0x28a   : > { %v920_v14 = vadd.f32 %v1068_v3, %v919_v12 }
 0x28b   : > { %v929_v15 = vadd.f32 %v925_v11, %v829_v10 }
 0x28c   : > { %v928_v16 = vadd.f32 %v920_v14, %v828_v13 }
 0x28d   : > { %v931_v17 = vmax.f32 %v929_v15, 0.0 }
 0x28e   : > { %v930_v18 = vmax.f32 %v928_v16, 0.0 }
 0x28f   : > { %933 = vst [vmem:[%s1981_s21 + $0x8] sm:$0xff] %v931_v17 }
 0x290   : > { %932 = vst [vmem:[%s1981_s21] sm:$0xff] %v930_v18 }
 0x291   : > { %1689 = shalt.err (!%p1686_p2)
}
 0x292   : > { %s1690_s19 = scalar_lea.hbm %s2050_s8, 256  ;;  %s1694_s3 = scalar_lea.hbm %s2111_s7, 512 }
 0x293   : > { %p1691_p3 = scmp.ne.s32.totalorder %s2050_s8, %s1690_s19  ;;  %p1695_p7 = scmp.lt.u32.totalorder %s2050_s8, %s2111_s7 }
 0x294   : > { %p1696_p9 = scmp.lt.u32.totalorder %s1694_s3, %s1690_s19  ;;  %p1698_p4 = scmp.lt.u32.totalorder %s1690_s19, %s2050_s8 }
 0x295   : > { %p1692_p5 = pnand %p1691_p3, %p2133_p1 }
 0x296   : > { %p1697_p12 = por %p1696_p9, %p1695_p7 }
 0x297   : > { %p1693_p6 = pneg %p1692_p5 }
 0x298   : > { %p1699_p13 = por %p1698_p4, %p1697_p12 }
 0x29a   : > { %p1700_p8 = pnand %p1699_p13, %p1693_p6 }
 0x29c   : > { %1703 = shalt.err (!%p1700_p8)
}
 0x29d   : > { %s1776_s15 = smov 128   ;;  %s1777_s22 = smov 8  }
 0x29e   : > { %1486 = dma.vmem_to_hbm [thread:$0]  (%p2133_p1), %s2052_s14, 256, %s2050_s8, %s2058_s10, %s1776_s15, %s1776_s15, %s1777_s22  }
 0x29f PF: > { %p1508_p10 = scmp.ge.s32.totalorder %s1764_s29, 2  ;;  %s965_s23 = sand.u32 1, %s1744_s24  }
 0x2a0   : > { %p2134_p11 = scmp.ne.s32.totalorder %s2124_s13, 0  ;;  %s966_s28 = scalar_lea.sflag [#allocation6], %s965_s23 }
 0x2a2   : > { %p1499_p0 = pnand %p1508_p10, %p2134_p11 }
 0x2a4   : > { %1739 = dma.done.wait (!%p1499_p0), %s966_s28, 256  }
 0x2a5   : > { %1741 = vsyncadd (!%p1499_p0), %s966_s28, 4294967040  ;;  %s22_s29 = sadd.s32 1, %s1764_s29   ;;  %s2135_s18 = sld [smem:[#allocation19_spill]] }
 0x2a6   : > { %p19_p2 = scmp.ge.s32.totalorder %s22_s29, 4   ;;  %s2136_s26 = sld [smem:[#allocation22_spill]] }
 0x2a7   : > { %s2137_s27 = sld [smem:[#allocation20_spill]]  ;;  %s2138_s28 = sld [smem:[#allocation21_spill]] }
 0x2a8   : > { %s2139_s24 = smov %s1748_s25  ;;  %21 = sbr.rel (!%p19_p2) target bundleno = 8 (0x8), region = 94 }
 0x2ab   : > { %s2140_s25 = smov %s2135_s18 }
 0x2af   :  { %971 = vsyncpa [#allocation5], 1 }
 0x2b0   :  { %973 = vsyncpa [#allocation5 + $0x1], 1 }
 0x2b1   :  { %974 = vsyncpa [#allocation8], 1 }
 0x2b2   :  { %975 = vsyncpa [#allocation6], 1 }
 0x2b3   :  { %977 = vsyncpa [#allocation6 + $0x1], 1 }
 0x2b4   :  { %978 = vsyncmov [#allocation3] }
 0x2b7   :  { %s979_s11 = vpop.sfrf %978 }
 0x2b8   :  { %p1074_p1 = scmp.ne.s32.totalorder %s979_s11, 0 }
 0x2ba   :  { %983 = shalt.err (%p1074_p1)  }

</bundles_post_ra>
